<compile_context>
chip_gen: v7x
topology: tpu7x:2x2x1
jax: 0.10.0
libtpu: 0.0.40
codegen_flags: <defaults>
</compile_context>

<pallas_src>
import functools

import jax
import jax.numpy as jnp
from jax.experimental import pallas as pl
from jax.experimental.pallas import tpu as pltpu


def _norm_kernel(x_ref, mean_ref, std_ref, o_ref, *, eps):
    # One reciprocal over the tiny (1, bf) row; hot loop is VPU sub + mul.
    x = x_ref[...].astype(jnp.float32)
    mean = mean_ref[...].astype(jnp.float32)
    std = std_ref[...].astype(jnp.float32)
    scale = 1.0 / (std + eps)
    o_ref[...] = ((x - mean) * scale).astype(o_ref.dtype)


def _round_up(v, m):
    return (v + m - 1) // m * m


def _cdiv(a, b):
    return (a + b - 1) // b


def _tpu_budget():
    """Returns (vmem_limit_bytes, per-tile byte target, min batch grid steps)."""
    try:
        vmem_cap = int(pltpu.get_tpu_info().vmem_capacity_bytes)
    except Exception:
        vmem_cap = 64 * 1024 * 1024  # conservative fallback
    if vmem_cap <= 64 * 1024 * 1024:
        # v7x-class: 64 MiB per TensorCore, 2 TCs/chip -> want >=2 batch steps.
        return 48 * 1024 * 1024, 6 * 1024 * 1024, 2
    # v5e / v6e: 128 MiB physical VMEM, 1 TC/chip.
    return 64 * 1024 * 1024, 8 * 1024 * 1024, 1


def norm_layer(x, mean, std, eps=1e-8):
    """Applies (x - mean) / (std + eps) with a Pallas TPU kernel.

    x:    (B, F)
    mean: (F,)
    std:  (F,)
    """
    B, F = x.shape
    dtype = x.dtype
    itemsize = jnp.dtype(dtype).itemsize

    vmem_limit, tile_bytes, min_batch_steps = _tpu_budget()

    mean2d = jnp.asarray(mean).reshape(1, F)
    std2d = jnp.asarray(std).reshape(1, F)

    kernel = functools.partial(_norm_kernel, eps=float(eps))

    # Prefer full-width feature blocks whenever even an 8-row tile at full
    # width fits the per-tile byte target (true for any realistic NormLayer F).
    full_width = 8 * F * itemsize <= tile_bytes

    if full_width:
        block_feat = F  # full-dim block: legal for any F, no padding/slicing
        bb = tile_bytes // max(1, block_feat * itemsize)
        bb = max(8, (bb // 8) * 8)
        if min_batch_steps > 1:
            bb = min(bb, _round_up(_cdiv(B, min_batch_steps), 8))
        block_batch = B if bb >= B else bb
        grid = (_cdiv(B, block_batch),)
        in_specs = [
            pl.BlockSpec((block_batch, block_feat), lambda i: (i, 0)),
            pl.BlockSpec((1, block_feat), lambda i: (0, 0)),
            pl.BlockSpec((1, block_feat), lambda i: (0, 0)),
        ]
        out_specs = pl.BlockSpec((block_batch, block_feat), lambda i: (i, 0))
        dims = ("parallel",)
    else:
        # Very large F: tile the feature axis too.  Batch is the innermost
        # grid axis so mean/std blocks stay resident across batch steps.
        # TODO(synk): optionally sweep pl.Buffered(3) on the x spec for v7x.
        block_feat = max(128, ((tile_bytes // (8 * itemsize)) // 128) * 128)
        block_feat = min(block_feat, _round_up(F, 128))
        bb = tile_bytes // (block_feat * itemsize)
        bb = max(8, (bb // 8) * 8)
        if min_batch_steps > 1:
            bb = min(bb, _round_up(_cdiv(B, min_batch_steps), 8))
        block_batch = B if bb >= B else bb
        grid = (_cdiv(F, block_feat), _cdiv(B, block_batch))
        in_specs = [
            pl.BlockSpec((block_batch, block_feat), lambda j, i: (i, j)),
            pl.BlockSpec((1, block_feat), lambda j, i: (0, j)),
            pl.BlockSpec((1, block_feat), lambda j, i: (0, j)),
        ]
        out_specs = pl.BlockSpec((block_batch, block_feat), lambda j, i: (i, j))
        dims = ("parallel", "parallel")

    return pl.pallas_call(
        kernel,
        out_shape=jax.ShapeDtypeStruct((B, F), dtype),
        grid_spec=pltpu.PrefetchScalarGridSpec(
            num_scalar_prefetch=0,
            grid=grid,
            in_specs=in_specs,
            out_specs=out_specs,
        ),
        compiler_params=pltpu.CompilerParams(
            dimension_semantics=dims,
            vmem_limit_bytes=vmem_limit,
        ),
    )(x, mean2d, std2d)


if __name__ == "__main__":
    key = jax.random.PRNGKey(0)
    kx, km, ks = jax.random.split(key, 3)

    B, F = 8, 32  # small shapes consistent with the module
    x = jax.random.normal(kx, (B, F), dtype=jnp.float32)
    # Deterministic "parameters": per-feature mean and (positive) std.
    mean = jax.random.normal(km, (F,), dtype=jnp.float32)
    std = jax.nn.softplus(jax.random.normal(ks, (F,), dtype=jnp.float32)) + 0.1

    eps = 1e-8
    out = norm_layer(x, mean, std, eps=eps)
    out = jax.block_until_ready(out)

    # Reference check (plain JAX)
    ref = (x - mean[None, :]) / (std[None, :] + eps)
    assert out.shape == (B, F)
    assert jnp.allclose(out, ref, atol=1e-5, rtol=1e-5)

    print("KERNEL_OK")
</pallas_src>

<mosaic_0001>
module attributes {stable_mosaic.version = 11 : i64} {
  func.func @_norm_kernel(%arg0: i32, %arg1: memref<8x32xf32, #tpu.memory_space<vmem>>, %arg2: memref<1x32xf32, #tpu.memory_space<vmem>>, %arg3: memref<1x32xf32, #tpu.memory_space<vmem>>, %arg4: memref<8x32xf32, #tpu.memory_space<vmem>>) attributes {dimension_semantics = [#tpu.dimension_semantics<parallel>], iteration_bounds = array<i64: 1>, scalar_prefetch = 0 : i64, scratch_operands = 0 : i64, tpu.core_type = #tpu.core_type<tc>, window_params = [{transform_indices = @transform_0, window_bounds = array<i64: 8, 32>}, {pipeline_mode = #tpu.pipeline_mode<synchronous>, transform_indices = @transform_1, window_bounds = array<i64: 1, 32>}, {pipeline_mode = #tpu.pipeline_mode<synchronous>, transform_indices = @transform_2, window_bounds = array<i64: 1, 32>}, {transform_indices = @transform_3, window_bounds = array<i64: 8, 32>}]} {
    %c0 = arith.constant 0 : index
    %c0_0 = arith.constant 0 : index
    %0 = vector.load %arg1[%c0, %c0_0] : memref<8x32xf32, #tpu.memory_space<vmem>>, vector<8x32xf32>
    %c0_1 = arith.constant 0 : index
    %c0_2 = arith.constant 0 : index
    %1 = vector.load %arg2[%c0_1, %c0_2] : memref<1x32xf32, #tpu.memory_space<vmem>>, vector<1x32xf32>
    %c0_3 = arith.constant 0 : index
    %c0_4 = arith.constant 0 : index
    %2 = vector.load %arg3[%c0_3, %c0_4] : memref<1x32xf32, #tpu.memory_space<vmem>>, vector<1x32xf32>
    %cst = arith.constant 9.99999993E-9 : f32
    %3 = vector.broadcast %cst : f32 to vector<1x32xf32>
    %4 = arith.addf %2, %3 : vector<1x32xf32>
    %cst_5 = arith.constant 1.000000e+00 : f32
    %5 = vector.broadcast %cst_5 : f32 to vector<1x32xf32>
    %6 = arith.divf %5, %4 : vector<1x32xf32>
    %7 = vector.broadcast %1 : vector<1x32xf32> to vector<8x32xf32>
    %8 = arith.subf %0, %7 : vector<8x32xf32>
    %9 = vector.broadcast %6 : vector<1x32xf32> to vector<8x32xf32>
    %10 = arith.mulf %8, %9 : vector<8x32xf32>
    %c0_6 = arith.constant 0 : index
    %c0_7 = arith.constant 0 : index
    %11 = vector.load %arg4[%c0_6, %c0_7] : memref<8x32xf32, #tpu.memory_space<vmem>>, vector<8x32xf32>
    tpu.vector_store %arg4[%c0_6, %c0_7], %10 {strides = array<i32>} : memref<8x32xf32, #tpu.memory_space<vmem>>, vector<8x32xf32>,
    return
  }
  func.func @transform_0(%arg0: i32) -> (i32, i32) {
    %c0_i32 = arith.constant 0 : i32
    %c0_i32_0 = arith.constant 0 : i32
    return %arg0, %c0_i32 : i32, i32
  }
  func.func @transform_1(%arg0: i32) -> (i32, i32) {
    %c0_i32 = arith.constant 0 : i32
    %c0_i32_0 = arith.constant 0 : i32
    %c0_i32_1 = arith.constant 0 : i32
    return %c0_i32, %c0_i32_0 : i32, i32
  }
  func.func @transform_2(%arg0: i32) -> (i32, i32) {
    %c0_i32 = arith.constant 0 : i32
    %c0_i32_0 = arith.constant 0 : i32
    %c0_i32_1 = arith.constant 0 : i32
    return %c0_i32, %c0_i32_0 : i32, i32
  }
  func.func @transform_3(%arg0: i32) -> (i32, i32) {
    %c0_i32 = arith.constant 0 : i32
    %c0_i32_0 = arith.constant 0 : i32
    return %arg0, %c0_i32 : i32, i32
  }
}

</mosaic_0001>

<bundles_post_ra>
// kernel: tpu_custom_call.1
= control target key start
LH: loop header
LB: loop body
LE: loop exit
PB: predicated region body
PF: predicated region fallthrough
CT: control target
= control target key end

     0   :  { %8 = vsyncpa [#allocation3], 0  ;;  %s169_s0 = inlined_call_operand.hbm [shape: f32[8,32], index: 0, kind: input, shape index: {}]   ;;  %s170_s1 = inlined_call_operand.vmem [shape: f32[1,32], index: 1, kind: input, shape index: {}]   ;;  %s171_s2 = inlined_call_operand.vmem [shape: f32[1,32], index: 2, kind: input, shape index: {}]   ;;  %s172_s3 = inlined_call_operand.hbm [shape: f32[8,32], index: 3, kind: output, shape index: {}]  }
   0x1   :  { %9 = vsyncpa [#allocation4], 0  ;;  %s117_s12 = smov [#allocation2]   ;;  %s69_s16 = scalar_lea.hbm %s169_s0, 128 }
   0x2   :  { %s16_s13 = sshll.u32 %s117_s12, 4  ;;  %p70_p0 = scmp.ne.s32.totalorder %s169_s0, %s69_s16  ;;  %s17_s13 = int_to_ptr.vmem [resolvable:$true] %s16_s13 }
   0x3   :  { %p73_p1 = scmp.lt.u32.totalorder %s69_s16, %s169_s0 }
   0x5   :  { %p75_p2 = pnand %p73_p1, %p70_p0 }
   0x7   :  { %78 = shalt.err (!%p75_p2)
}
   0x8   :  { %s79_s21 = scalar_lea.vmem %s17_s13, 128  ;;  %p84_p4 = scmp.lt.s32.totalorder %s17_s13, %s17_s13 }
   0x9   :  { %p80_p3 = scmp.ne.s32.totalorder %s17_s13, %s79_s21  ;;  %p85_p5 = scmp.lt.s32.totalorder %s79_s21, %s79_s21 }
   0xb   :  { %p86_p6 = por %p85_p5, %p84_p4 }
   0xd   :  { %p87_p7 = pnand %p86_p6, %p80_p3 }
   0xf   :  { %90 = shalt.err (!%p87_p7)
}
  0x10   :  { %19 = dma.hbm_to_vmem [thread:$0]  %s169_s0, 128, %s17_s13, [#allocation3]  }
  0x11   :  { %113 = dma.done.wait [#allocation3], 128  }
  0x12   :  { %114 = vsyncadd [#allocation3], 4294967168  ;;  %v29_v0 = vld [vmem:[%s171_s2] sm:$0x1]  ;;  %v41_v2 = vlaneseq  ;;  %s118_s28 = smov [#allocation5]   ;;  %vm47_vm0 = vcmask 261120  }
  0x13   :  { %v30_v1 = vadd.f32 1e-08, %v29_v0  ;;  %v27_v4 = vld [vmem:[#allocation2] sm:$0xff]  ;;  %s55_s0 = sshll.u32 %s118_s28, 4  ;;  %s56_s0 = int_to_ptr.vmem [resolvable:$true] %s55_s0 }
  0x14   :  { %v42_v3 = vshrl.u32 %v41_v2, 7  ;;  %v64_v5 = vld [vmem:[%s170_s1] ss:$0 sm:$0xff]  ;;  %s91_s2 = scalar_lea.vmem %s56_s0, 128  ;;  %p96_p9 = scmp.lt.s32.totalorder %s56_s0, %s56_s0 }
  0x15   :  { %67 = vrcp.f32 %v30_v1  ;;  %v39_v7 = vsub.f32 %v27_v4, %v64_v5  ;;  %p92_p8 = scmp.ne.s32.totalorder %s56_s0, %s91_s2  ;;  %p97_p10 = scmp.lt.s32.totalorder %s91_s2, %s91_s2 }
  0x16   :  { %v43_v6 = vsub.s32 0, %v42_v3 }
  0x17   :  { %p98_p11 = por %p97_p10, %p96_p9 }
  0x19   :  { %p99_p12 = pnand %p98_p11, %p92_p8 }
  0x1f   :  { %v68_v8 = vpop.eup %67 }
  0x20   :  { %v44_v9 = vrot.slane %v68_v8, %v43_v6 }
  0x22   :  { %v46_v10 = vmul.f32 %v44_v9, %v39_v7 }
  0x24   :  { %48 = vst.msk [vmem:[#allocation5] sm:$0xff] %vm47_vm0, %v46_v10 }
  0x25   :  { %102 = shalt.err (!%p99_p12)
}
  0x26   :  { %s103_s1 = scalar_lea.hbm %s172_s3, 128 }
  0x27   :  { %p104_p13 = scmp.ne.s32.totalorder %s172_s3, %s103_s1  ;;  %p107_p0 = scmp.lt.u32.totalorder %s103_s1, %s172_s3 }
  0x29   :  { %p109_p1 = pnand %p107_p0, %p104_p13 }
  0x2b   :  { %112 = shalt.err (!%p109_p1)
}
  0x2c   :  { %58 = dma.vmem_to_hbm [thread:$0]  %s56_s0, 128, %s172_s3, [#allocation4]  }
  0x2d   :  { %115 = dma.done.wait [#allocation4], 128  }
  0x2e   :  { %116 = vsyncadd [#allocation4], 4294967168 }
  0x2f   :  { %62 = vsyncpa [#allocation3], 1 }
  0x30   :  { %63 = vsyncpa [#allocation4], 1 }

</bundles_post_ra>
